<compile_context>
chip_gen: v6e
topology: v6e:2x2x1
jax: 0.10.0
libtpu: 0.0.40
codegen_flags: <defaults>
</compile_context>

<pallas_src>
import functools
import math

import jax
import jax.numpy as jnp
from jax.experimental import pallas as pl
from jax.experimental.pallas import tpu as pltpu


_MASK_NEG = -1e30  # large finite negative: exp() underflows to exactly 0,
                   # matching masked_fill(-inf) for rows with >=1 unmasked key,
                   # and avoiding NaN for fully-masked rows.


# ----------------------------------------------------------------------------
# Pallas kernel
# ----------------------------------------------------------------------------
def _graphormer_mha_kernel(
    *refs,
    num_heads: int,
    head_dim: int,
    fused_qkv: bool,
    has_edge_bias: bool,
    has_attn_mask: bool,
    has_kpm: bool,
    exp_dtype,
    approx_recip: bool,
):
    it = iter(refs)
    if fused_qkv:
        x_ref = next(it)                     # (Bb, T, E)
    else:
        xq_ref = next(it)                    # (Bb, T, E)
        xk_ref = next(it)                    # (Bb, S, E)
        xv_ref = next(it)                    # (Bb, S, E)
    eb_ref = next(it) if has_edge_bias else None     # (Bb, T, S)
    am_ref = next(it) if has_attn_mask else None     # (1|Bb, T, S)
    kpm_ref = next(it) if has_kpm else None          # (Bb, 1, S) additive
    if fused_qkv:
        wqkv_ref, bqkv_ref = next(it), next(it)      # (E, 3E), (1, 3E)
    else:
        wq_ref, bq_ref = next(it), next(it)
        wk_ref, bk_ref = next(it), next(it)
        wv_ref, bv_ref = next(it), next(it)
    wo_ref, bo_ref = next(it), next(it)              # (E, E), (1, E)
    out_ref = next(it)                               # (Bb, T, E)

    E = num_heads * head_dim
    D = head_dim
    mxu_dtype = wo_ref.dtype  # bf16 or f32, chosen by the wrapper

    # ---- projections (MXU, f32 accumulation) -------------------------------
    if fused_qkv:
        xb = x_ref[...]                      # (Bb, T, E)
        Bb, T, _ = xb.shape
        S = T
        qkv = jnp.dot(xb.reshape(Bb * T, E), wqkv_ref[...],
                      preferred_element_type=jnp.float32)
        qkv = qkv + bqkv_ref[...].astype(jnp.float32)          # (Bb*T, 3E)
        q = qkv[:, :E].astype(mxu_dtype).reshape(Bb, T, E)
        k = qkv[:, E:2 * E].astype(mxu_dtype).reshape(Bb, S, E)
        v = qkv[:, 2 * E:].astype(mxu_dtype).reshape(Bb, S, E)
    else:
        xq = xq_ref[...]
        xk = xk_ref[...]
        xv = xv_ref[...]
        Bb, T, _ = xq.shape
        S = xk.shape[1]

        def proj(x, L, w_ref, b_ref):
            y = jnp.dot(x.reshape(Bb * L, E), w_ref[...],
                        preferred_element_type=jnp.float32)
            y = y + b_ref[...].astype(jnp.float32)
            return y.astype(mxu_dtype).reshape(Bb, L, E)

        q = proj(xq, T, wq_ref, bq_ref)
        k = proj(xk, S, wk_ref, bk_ref)
        v = proj(xv, S, wv_ref, bv_ref)

    # ---- combined additive bias (f32, folded in-kernel) ---------------------
    bias = None
    if am_ref is not None:
        bias = am_ref[...].astype(jnp.float32)                 # (1|Bb, T, S)
    if kpm_ref is not None:
        kpm = kpm_ref[...].astype(jnp.float32)                 # (Bb, 1, S)
        bias = kpm if bias is None else bias + kpm
    if eb_ref is not None:
        eb = eb_ref[...].astype(jnp.float32)                   # (Bb, T, S)
        bias = eb if bias is None else bias + eb

    # ---- per-head attention, accumulated directly into the O-projection ----
    # (softmax scale is already folded into wq/bq by the wrapper)
    qk_dims = (((2,), (2,)), ((0,), (0,)))   # contract head_dim, batch over Bb
    pv_dims = (((2,), (1,)), ((0,), (0,)))   # contract S,        batch over Bb

    wo = wo_ref[...]                                            # (E, E)
    acc = jnp.zeros((Bb * T, E), jnp.float32)
    for h in range(num_heads):
        sl = slice(h * D, (h + 1) * D)
        qh = q[:, :, sl]                     # (Bb, T, D)
        kh = k[:, :, sl]                     # (Bb, S, D)
        vh = v[:, :, sl]                     # (Bb, S, D)

        scores = jax.lax.dot_general(
            qh, kh, dimension_numbers=qk_dims,
            preferred_element_type=jnp.float32)                # (Bb, T, S) f32
        if bias is not None:
            scores = scores + bias

        # numerically-stable softmax over S; exp optionally in bf16 (v6e/v7x)
        m = jnp.max(scores, axis=-1, keepdims=True)            # f32
        p = jnp.exp((scores - m).astype(exp_dtype))            # exp_dtype
        denom = jnp.sum(p.astype(jnp.float32), axis=-1, keepdims=True)

        # TODO(synk): attention dropout (nn.Dropout) is identity in eval mode;
        # not applied here (deterministic inference semantics).

        # unnormalized PV, then rescale the (T, D) context (cheaper than
        # rescaling the (T, S) probabilities; exact by linearity).
        ctx = jax.lax.dot_general(
            p.astype(mxu_dtype), vh, dimension_numbers=pv_dims,
            preferred_element_type=jnp.float32)                # (Bb, T, D) f32
        if approx_recip:
            ctx = ctx * pl.reciprocal(denom, approx=True)
        else:
            ctx = ctx / denom

        # fold this head's slice of the output projection (no concat)
        acc = acc + jnp.dot(
            ctx.reshape(Bb * T, D).astype(mxu_dtype), wo[sl, :],
            preferred_element_type=jnp.float32)                # (Bb*T, E)

    out = acc + bo_ref[...].astype(jnp.float32)
    out_ref[...] = out.reshape(Bb, T, E).astype(out_ref.dtype)


# ----------------------------------------------------------------------------
# Wrapper
# ----------------------------------------------------------------------------
def _choose_block_b(B, T, S, *, row_target=256, score_budget_bytes=2 << 20,
                    min_grid_steps=4):
    """Pick batch-block so block_b*T approaches row_target (multiple-of-128 MXU
    rows), while (a) keeping >= min_grid_steps grid steps when possible (>=2
    per TensorCore on v7x megacore) and (b) capping block_b so per-head f32
    scores stay within a small VMEM budget (avoid score-spill regime)."""
    divisors = [d for d in range(1, B + 1) if B % d == 0]
    cands = divisors
    for steps in (min_grid_steps, 2, 1):
        sel = [d for d in divisors if B // d >= steps]
        if sel:
            cands = sel
            break
    capped = [d for d in cands if d * T * S * 4 <= score_budget_bytes]
    if not capped:
        capped = [cands[0]]          # smallest divisor (1)
    for d in capped:
        if d * T >= row_target:
            return d
    return capped[-1]


def _vmem_cap_bytes():
    """Physical VMEM minus headroom (never request all of v7x's 64 MiB)."""
    cap = 48 << 20
    try:
        info = pltpu.get_tpu_info()
        phys = getattr(info, "vmem_capacity_bytes", None)
        if phys:
            cap = max(min(int(phys) - (12 << 20), 112 << 20), 32 << 20)
    except Exception:
        pass
    return cap


def graphormer_mha(
    query, key, value, params,
    *,
    num_heads: int,
    edge_bias=None,
    key_padding_mask=None,
    attn_mask=None,
    compute_dtype=jnp.bfloat16,  # bf16 MXU inputs by default; f32 acc/softmax
    exp_dtype=None,              # jnp.bfloat16 on v6e/v7x (bf16 EUP); f32 else
    block_b=None,
    row_target=256,              # raise to 512 on v6e (128 MiB VMEM)
):
    B, T, E = query.shape
    _, S, _ = key.shape
    head_dim = E // num_heads
    assert head_dim * num_heads == E, "embed_dim must be divisible by num_heads"
    scale = head_dim ** (-0.5)
    out_dtype = query.dtype
    cd = jnp.dtype(compute_dtype)
    is_bf16 = cd == jnp.dtype(jnp.bfloat16)
    if exp_dtype is None:
        exp_dtype = jnp.float32  # safe default (v5e has no bf16 EUP/VPU)
    approx_recip = is_bf16       # exact division on the f32 path

    # self-attention fast path: one fused QKV projection
    fused_qkv = (query is key) and (key is value)

    if block_b is None:
        block_b = _choose_block_b(B, T, S, row_target=row_target)
    assert B % block_b == 0
    grid = (B // block_b,)

    # ---- parameters (fold softmax scale into the Q projection; free) -------
    wq = params["wq"].astype(jnp.float32) * scale
    bq = params["bq"].astype(jnp.float32) * scale
    wk = params["wk"].astype(jnp.float32)
    bk = params["bk"].astype(jnp.float32)
    wv = params["wv"].astype(jnp.float32)
    bv = params["bv"].astype(jnp.float32)
    wo = params["wo"].astype(jnp.float32)
    bo = params["bo"].astype(jnp.float32)

    operands = []
    in_specs = []

    # activations
    if fused_qkv:
        operands.append(query.astype(cd))
        in_specs.append(pl.BlockSpec((block_b, T, E), lambda b: (b, 0, 0)))
    else:
        operands += [query.astype(cd), key.astype(cd), value.astype(cd)]
        in_specs += [
            pl.BlockSpec((block_b, T, E), lambda b: (b, 0, 0)),
            pl.BlockSpec((block_b, S, E), lambda b: (b, 0, 0)),
            pl.BlockSpec((block_b, S, E), lambda b: (b, 0, 0)),
        ]

    # optional additive score terms — shipped narrow, folded to f32 in-kernel
    # (PyTorch module silently ignores edge_bias when T != S; mirrored here).
    has_edge_bias = (edge_bias is not None) and (T == S)
    eb_op = None
    if has_edge_bias:
        eb_op = edge_bias.astype(jnp.bfloat16) if is_bf16 else edge_bias
        operands.append(eb_op)
        in_specs.append(pl.BlockSpec((block_b, T, S), lambda b: (b, 0, 0)))

    has_attn_mask = attn_mask is not None
    am = None
    if has_attn_mask:
        am = attn_mask
        if am.dtype == jnp.bool_:
            # torch convention: True = disallowed -> large negative additive
            am = jnp.where(am, jnp.float32(_MASK_NEG), jnp.float32(0.0))
        if is_bf16:
            am = am.astype(jnp.bfloat16)
        if am.ndim == 2:
            am = am[None]  # (1, T, S), broadcast over batch inside the kernel
            in_specs.append(pl.BlockSpec((1, T, S), lambda b: (0, 0, 0)))
        else:
            in_specs.append(pl.BlockSpec((block_b, T, S), lambda b: (b, 0, 0)))
        operands.append(am)

    has_kpm = key_padding_mask is not None
    kpm_add = None
    if has_kpm:
        # tiny (B, 1, S) additive tensor; large finite NEG instead of -inf.
        kpm_add = jnp.where(key_padding_mask[:, None, :],
                            jnp.float32(_MASK_NEG), jnp.float32(0.0)).astype(cd)
        operands.append(kpm_add)
        in_specs.append(pl.BlockSpec((block_b, 1, S), lambda b: (b, 0, 0)))

    # weights (resident across the grid; index_map constant)
    # TODO(synk): pipeline_mode=pl.Buffered(1) on these specs to single-buffer
    # the weights once validated on the target jax version.
    if fused_qkv:
        wqkv = jnp.concatenate([wq, wk, wv], axis=1).astype(cd)   # (E, 3E)
        bqkv = jnp.concatenate([bq, bk, bv], axis=1).astype(cd)   # (1, 3E)
        operands += [wqkv, bqkv]
        in_specs += [pl.BlockSpec((E, 3 * E), lambda b: (0, 0)),
                     pl.BlockSpec((1, 3 * E), lambda b: (0, 0))]
    else:
        for w_mat, b_vec in ((wq, bq), (wk, bk), (wv, bv)):
            operands += [w_mat.astype(cd), b_vec.astype(cd)]
            in_specs += [pl.BlockSpec((E, E), lambda b: (0, 0)),
                         pl.BlockSpec((1, E), lambda b: (0, 0))]
    operands += [wo.astype(cd), bo.astype(cd)]
    in_specs += [pl.BlockSpec((E, E), lambda b: (0, 0)),
                 pl.BlockSpec((1, E), lambda b: (0, 0))]

    kernel = functools.partial(
        _graphormer_mha_kernel,
        num_heads=num_heads,
        head_dim=head_dim,
        fused_qkv=fused_qkv,
        has_edge_bias=has_edge_bias,
        has_attn_mask=has_attn_mask,
        has_kpm=has_kpm,
        exp_dtype=exp_dtype,
        approx_recip=approx_recip,
    )

    # VMEM budget: double-buffered streams + weights, plus the in-kernel
    # working set (f32 qkv intermediate, per-head scores/probs, accumulator),
    # plus Mosaic scratch headroom.  Capped below physical VMEM.
    isz = cd.itemsize
    stream = block_b * T * E * isz                                 # q/x block
    if not fused_qkv:
        stream += 2 * block_b * S * E * isz                        # k, v blocks
    if has_edge_bias:
        stream += block_b * T * S * jnp.dtype(eb_op.dtype).itemsize
    if has_attn_mask:
        am_rows = 1 if am.shape[0] == 1 else block_b
        stream += am_rows * T * S * jnp.dtype(am.dtype).itemsize
    if has_kpm:
        stream += block_b * S * jnp.dtype(kpm_add.dtype).itemsize
    stream += block_b * T * E * jnp.dtype(out_dtype).itemsize      # out block
    weights = (4 * E * E + 4 * E) * isz
    work = 3 * block_b * max(T, S) * E * 4                         # f32 qkv
    work += block_b * T * S * (4 + jnp.dtype(exp_dtype).itemsize)  # scores + p
    work += block_b * T * E * 4                                    # accumulator
    need = 2 * (stream + weights) + work + (6 << 20)
    vmem_limit = min(need, _vmem_cap_bytes()) if need > (16 << 20) else None

    out = pl.pallas_call(
        kernel,
        out_shape=jax.ShapeDtypeStruct((B, T, E), out_dtype),
        grid_spec=pltpu.PrefetchScalarGridSpec(
            num_scalar_prefetch=0,
            grid=grid,
            in_specs=in_specs,
            out_specs=pl.BlockSpec((block_b, T, E), lambda b: (b, 0, 0)),
        ),
        compiler_params=pltpu.CompilerParams(
            dimension_semantics=("parallel",),
            vmem_limit_bytes=vmem_limit,
        ),
    )(*operands)

    # PyTorch module returns (output, None)
    return out, None


# ----------------------------------------------------------------------------
# Pure-JAX reference (PyTorch semantics, incl. masks) for verification
# ----------------------------------------------------------------------------
def graphormer_mha_ref(query, key, value, params, *, num_heads,
                       edge_bias=None, key_padding_mask=None, attn_mask=None):
    B, T, E = query.shape
    _, S, _ = key.shape
    D = E // num_heads
    scale = D ** (-0.5)

    def lin(x, w, b):
        return x @ w + b  # w already [in, out]

    q = lin(query, params["wq"], params["bq"]).reshape(B, T, num_heads, D).transpose(0, 2, 1, 3)
    k = lin(key, params["wk"], params["bk"]).reshape(B, S, num_heads, D).transpose(0, 2, 1, 3)
    v = lin(value, params["wv"], params["bv"]).reshape(B, S, num_heads, D).transpose(0, 2, 1, 3)

    scores = jnp.einsum("bhtd,bhsd->bhts", q, k) * scale
    if attn_mask is not None:
        am = attn_mask
        am = am[None, None] if am.ndim == 2 else am[:, None]
        scores = scores + am
    if key_padding_mask is not None:
        scores = jnp.where(key_padding_mask[:, None, None, :], -jnp.inf, scores)
    if edge_bias is not None and T == S:
        scores = scores + edge_bias[:, None]
    probs = jax.nn.softmax(scores, axis=-1)
    ctx = jnp.einsum("bhts,bhsd->bhtd", probs, v)
    ctx = ctx.transpose(0, 2, 1, 3).reshape(B, T, E)
    return lin(ctx, params["wo"], params["bo"])


# ----------------------------------------------------------------------------
# Main
# ----------------------------------------------------------------------------
if __name__ == "__main__":
    B, T, S, E, H = 8, 8, 8, 32, 4

    key0 = jax.random.PRNGKey(0)
    keys = jax.random.split(key0, 16)

    bound = 1.0 / math.sqrt(E)
    def init_w(k):
        return jax.random.uniform(k, (E, E), jnp.float32, -bound, bound)
    def init_b(k):
        return jax.random.uniform(k, (1, E), jnp.float32, -bound, bound)

    params = {
        "wq": init_w(keys[0]), "bq": init_b(keys[1]),
        "wk": init_w(keys[2]), "bk": init_b(keys[3]),
        "wv": init_w(keys[4]), "bv": init_b(keys[5]),
        "wo": init_w(keys[6]), "bo": init_b(keys[7]),
    }

    x = jax.random.normal(keys[8], (B, T, E), jnp.float32)
    edge_bias = 0.1 * jax.random.normal(keys[9], (B, T, T), jnp.float32)

    # --- 1) self-attention (fused QKV), f32 compute (strict check) ----------
    out, attn_w = graphormer_mha(x, x, x, params, num_heads=H,
                                 edge_bias=edge_bias,
                                 compute_dtype=jnp.float32)
    out = jax.block_until_ready(out)
    ref = graphormer_mha_ref(x, x, x, params, num_heads=H, edge_bias=edge_bias)
    ref = jax.block_until_ready(ref)
    assert out.shape == (B, T, E)
    assert attn_w is None
    err = float(jnp.max(jnp.abs(out - ref)))
    assert err < 5e-3, f"self-attn f32 mismatch: {err}"

    # --- 2) self-attention, default bf16 MXU inputs + bf16 exp --------------
    # (f32 accumulation and softmax statistics; bf16 exp targets v6e/v7x EUP)
    out_bf16, _ = graphormer_mha(x, x, x, params, num_heads=H,
                                 edge_bias=edge_bias,
                                 exp_dtype=jnp.bfloat16)
    out_bf16 = jax.block_until_ready(out_bf16)
    err_bf16 = float(jnp.max(jnp.abs(out_bf16.astype(jnp.float32) - ref)))
    assert err_bf16 < 0.25, f"self-attn bf16 mismatch: {err_bf16}"

    # --- 3) cross-attention with key_padding_mask + 2-D attn_mask (f32) -----
    key_t = jax.random.normal(keys[10], (B, S, E), jnp.float32)
    value_t = jax.random.normal(keys[11], (B, S, E), jnp.float32)
    kpm = jnp.zeros((B, S), jnp.bool_).at[:, -2:].set(True)   # >=1 key unmasked/row
    attn_mask_2d = 0.05 * jax.random.normal(keys[12], (T, S), jnp.float32)

    out_x, _ = graphormer_mha(x, key_t, value_t, params, num_heads=H,
                              key_padding_mask=kpm, attn_mask=attn_mask_2d,
                              compute_dtype=jnp.float32)
    out_x = jax.block_until_ready(out_x)
    ref_x = graphormer_mha_ref(x, key_t, value_t, params, num_heads=H,
                               key_padding_mask=kpm, attn_mask=attn_mask_2d)
    err_x = float(jnp.max(jnp.abs(out_x - ref_x)))
    assert err_x < 5e-3, f"cross-attn masked mismatch: {err_x}"

    # --- 4) boolean (causal) attn_mask handling, f32 compute -----------------
    causal_bool = ~jnp.tril(jnp.ones((T, S), jnp.bool_))      # True = disallowed
    causal_add = jnp.where(causal_bool, jnp.float32(_MASK_NEG), jnp.float32(0.0))
    out_c, _ = graphormer_mha(x, key_t, value_t, params, num_heads=H,
                              attn_mask=causal_bool,
                              compute_dtype=jnp.float32)
    out_c = jax.block_until_ready(out_c)
    ref_c = graphormer_mha_ref(x, key_t, value_t, params, num_heads=H,
                               attn_mask=causal_add)
    err_c = float(jnp.max(jnp.abs(out_c - ref_c)))
    assert err_c < 5e-3, f"bool attn_mask mismatch: {err_c}"

    print("KERNEL_OK")
</pallas_src>

<mosaic_0001>
module attributes {stable_mosaic.version = 11 : i64} {
  func.func @_graphormer_mha_kernel(%arg0: i32, %arg1: memref<2x8x32xf32, #tpu.memory_space<vmem>>, %arg2: memref<2x8x8xf32, #tpu.memory_space<vmem>>, %arg3: memref<32x96xf32, #tpu.memory_space<vmem>>, %arg4: memref<1x96xf32, #tpu.memory_space<vmem>>, %arg5: memref<32x32xf32, #tpu.memory_space<vmem>>, %arg6: memref<1x32xf32, #tpu.memory_space<vmem>>, %arg7: memref<2x8x32xf32, #tpu.memory_space<vmem>>) attributes {dimension_semantics = [#tpu.dimension_semantics<parallel>], iteration_bounds = array<i64: 4>, scalar_prefetch = 0 : i64, scratch_operands = 0 : i64, tpu.core_type = #tpu.core_type<tc>, window_params = [{transform_indices = @transform_0, window_bounds = array<i64: 2, 8, 32>}, {transform_indices = @transform_1, window_bounds = array<i64: 2, 8, 8>}, {pipeline_mode = #tpu.pipeline_mode<synchronous>, transform_indices = @transform_2, window_bounds = array<i64: 32, 96>}, {pipeline_mode = #tpu.pipeline_mode<synchronous>, transform_indices = @transform_3, window_bounds = array<i64: 1, 96>}, {pipeline_mode = #tpu.pipeline_mode<synchronous>, transform_indices = @transform_4, window_bounds = array<i64: 32, 32>}, {pipeline_mode = #tpu.pipeline_mode<synchronous>, transform_indices = @transform_5, window_bounds = array<i64: 1, 32>}, {transform_indices = @transform_6, window_bounds = array<i64: 2, 8, 32>}]} {
    %c0 = arith.constant 0 : index
    %c0_0 = arith.constant 0 : index
    %c0_1 = arith.constant 0 : index
    %0 = vector.load %arg1[%c0, %c0_0, %c0_1] : memref<2x8x32xf32, #tpu.memory_space<vmem>>, vector<2x8x32xf32>
    %1 = vector.shape_cast %0 : vector<2x8x32xf32> to vector<16x32xf32>
    %c0_2 = arith.constant 0 : index
    %c0_3 = arith.constant 0 : index
    %2 = vector.load %arg3[%c0_2, %c0_3] : memref<32x96xf32, #tpu.memory_space<vmem>>, vector<32x96xf32>
    %cst = arith.constant dense<0.000000e+00> : vector<16x96xf32>
    %3 = tpu.matmul %1, %2, %cst {dimension_numbers = #tpu.dot_dimension_numbers<[1], [0], [0], [1], [0, 0, 1, 1], [], []>} : vector<16x32xf32>, vector<32x96xf32>, vector<16x96xf32> -> vector<16x96xf32>
    %c0_4 = arith.constant 0 : index
    %c0_5 = arith.constant 0 : index
    %4 = vector.load %arg4[%c0_4, %c0_5] : memref<1x96xf32, #tpu.memory_space<vmem>>, vector<1x96xf32>
    %5 = vector.broadcast %4 : vector<1x96xf32> to vector<16x96xf32>
    %6 = arith.addf %3, %5 : vector<16x96xf32>
    %7 = vector.extract_strided_slice %6 {offsets = [0, 0], sizes = [16, 32], strides = [1, 1]} : vector<16x96xf32> to vector<16x32xf32>
    %8 = vector.shape_cast %7 : vector<16x32xf32> to vector<2x8x32xf32>
    %9 = vector.extract_strided_slice %6 {offsets = [0, 32], sizes = [16, 32], strides = [1, 1]} : vector<16x96xf32> to vector<16x32xf32>
    %10 = vector.shape_cast %9 : vector<16x32xf32> to vector<2x8x32xf32>
    %11 = vector.extract_strided_slice %6 {offsets = [0, 64], sizes = [16, 32], strides = [1, 1]} : vector<16x96xf32> to vector<16x32xf32>
    %12 = vector.shape_cast %11 : vector<16x32xf32> to vector<2x8x32xf32>
    %c0_6 = arith.constant 0 : index
    %c0_7 = arith.constant 0 : index
    %c0_8 = arith.constant 0 : index
    %13 = vector.load %arg2[%c0_6, %c0_7, %c0_8] : memref<2x8x8xf32, #tpu.memory_space<vmem>>, vector<2x8x8xf32>
    %c0_9 = arith.constant 0 : index
    %c0_10 = arith.constant 0 : index
    %14 = vector.load %arg5[%c0_9, %c0_10] : memref<32x32xf32, #tpu.memory_space<vmem>>, vector<32x32xf32>
    %cst_11 = arith.constant 0.000000e+00 : f32
    %15 = vector.broadcast %cst_11 : f32 to vector<16x32xf32>
    %16 = vector.extract_strided_slice %8 {offsets = [0, 0, 0], sizes = [2, 8, 8], strides = [1, 1, 1]} : vector<2x8x32xf32> to vector<2x8x8xf32>
    %17 = vector.extract_strided_slice %10 {offsets = [0, 0, 0], sizes = [2, 8, 8], strides = [1, 1, 1]} : vector<2x8x32xf32> to vector<2x8x8xf32>
    %18 = vector.extract_strided_slice %12 {offsets = [0, 0, 0], sizes = [2, 8, 8], strides = [1, 1, 1]} : vector<2x8x32xf32> to vector<2x8x8xf32>
    %cst_12 = arith.constant dense<0.000000e+00> : vector<2x8x8xf32>
    %19 = tpu.matmul %16, %17, %cst_12 {dimension_numbers = #tpu.dot_dimension_numbers<[2], [2], [1], [1], [0, 0, 0, 1, 1, 1], [0], [0]>} : vector<2x8x8xf32>, vector<2x8x8xf32>, vector<2x8x8xf32> -> vector<2x8x8xf32>
    %20 = arith.addf %19, %13 : vector<2x8x8xf32>
    %cst_13 = arith.constant dense<0xFF800000> : vector<2x8xf32>
    %21 = vector.multi_reduction <maximumf>, %20, %cst_13 [2] : vector<2x8x8xf32> to vector<2x8xf32>
    %22 = vector.shape_cast %21 : vector<2x8xf32> to vector<2x8x1xf32>
    %23 = vector.broadcast %22 : vector<2x8x1xf32> to vector<2x8x8xf32>
    %24 = arith.subf %20, %23 : vector<2x8x8xf32>
    %25 = math.exp %24 : vector<2x8x8xf32>
    %cst_14 = arith.constant dense<0.000000e+00> : vector<2x8xf32>
    %26 = vector.multi_reduction <add>, %25, %cst_14 [2] : vector<2x8x8xf32> to vector<2x8xf32>
    %27 = vector.shape_cast %26 : vector<2x8xf32> to vector<2x8x1xf32>
    %cst_15 = arith.constant dense<0.000000e+00> : vector<2x8x8xf32>
    %28 = tpu.matmul %25, %18, %cst_15 {dimension_numbers = #tpu.dot_dimension_numbers<[2], [1], [1], [2], [0, 0, 0, 1, 1, 2], [0], [0]>} : vector<2x8x8xf32>, vector<2x8x8xf32>, vector<2x8x8xf32> -> vector<2x8x8xf32>
    %29 = vector.broadcast %27 : vector<2x8x1xf32> to vector<2x8x8xf32>
    %30 = arith.divf %28, %29 : vector<2x8x8xf32>
    %31 = vector.shape_cast %30 : vector<2x8x8xf32> to vector<16x8xf32>
    %32 = vector.extract_strided_slice %14 {offsets = [0, 0], sizes = [8, 32], strides = [1, 1]} : vector<32x32xf32> to vector<8x32xf32>
    %cst_16 = arith.constant dense<0.000000e+00> : vector<16x32xf32>
    %33 = tpu.matmul %31, %32, %cst_16 {dimension_numbers = #tpu.dot_dimension_numbers<[1], [0], [0], [1], [0, 0, 1, 1], [], []>} : vector<16x8xf32>, vector<8x32xf32>, vector<16x32xf32> -> vector<16x32xf32>
    %34 = arith.addf %15, %33 : vector<16x32xf32>
    %35 = vector.extract_strided_slice %8 {offsets = [0, 0, 8], sizes = [2, 8, 8], strides = [1, 1, 1]} : vector<2x8x32xf32> to vector<2x8x8xf32>
    %36 = vector.extract_strided_slice %10 {offsets = [0, 0, 8], sizes = [2, 8, 8], strides = [1, 1, 1]} : vector<2x8x32xf32> to vector<2x8x8xf32>
    %37 = vector.extract_strided_slice %12 {offsets = [0, 0, 8], sizes = [2, 8, 8], strides = [1, 1, 1]} : vector<2x8x32xf32> to vector<2x8x8xf32>
    %cst_17 = arith.constant dense<0.000000e+00> : vector<2x8x8xf32>
    %38 = tpu.matmul %35, %36, %cst_17 {dimension_numbers = #tpu.dot_dimension_numbers<[2], [2], [1], [1], [0, 0, 0, 1, 1, 1], [0], [0]>} : vector<2x8x8xf32>, vector<2x8x8xf32>, vector<2x8x8xf32> -> vector<2x8x8xf32>
    %39 = arith.addf %38, %13 : vector<2x8x8xf32>
    %cst_18 = arith.constant dense<0xFF800000> : vector<2x8xf32>
    %40 = vector.multi_reduction <maximumf>, %39, %cst_18 [2] : vector<2x8x8xf32> to vector<2x8xf32>
    %41 = vector.shape_cast %40 : vector<2x8xf32> to vector<2x8x1xf32>
    %42 = vector.broadcast %41 : vector<2x8x1xf32> to vector<2x8x8xf32>
    %43 = arith.subf %39, %42 : vector<2x8x8xf32>
    %44 = math.exp %43 : vector<2x8x8xf32>
    %cst_19 = arith.constant dense<0.000000e+00> : vector<2x8xf32>
    %45 = vector.multi_reduction <add>, %44, %cst_19 [2] : vector<2x8x8xf32> to vector<2x8xf32>
    %46 = vector.shape_cast %45 : vector<2x8xf32> to vector<2x8x1xf32>
    %cst_20 = arith.constant dense<0.000000e+00> : vector<2x8x8xf32>
    %47 = tpu.matmul %44, %37, %cst_20 {dimension_numbers = #tpu.dot_dimension_numbers<[2], [1], [1], [2], [0, 0, 0, 1, 1, 2], [0], [0]>} : vector<2x8x8xf32>, vector<2x8x8xf32>, vector<2x8x8xf32> -> vector<2x8x8xf32>
    %48 = vector.broadcast %46 : vector<2x8x1xf32> to vector<2x8x8xf32>
    %49 = arith.divf %47, %48 : vector<2x8x8xf32>
    %50 = vector.shape_cast %49 : vector<2x8x8xf32> to vector<16x8xf32>
    %51 = vector.extract_strided_slice %14 {offsets = [8, 0], sizes = [8, 32], strides = [1, 1]} : vector<32x32xf32> to vector<8x32xf32>
    %cst_21 = arith.constant dense<0.000000e+00> : vector<16x32xf32>
    %52 = tpu.matmul %50, %51, %cst_21 {dimension_numbers = #tpu.dot_dimension_numbers<[1], [0], [0], [1], [0, 0, 1, 1], [], []>} : vector<16x8xf32>, vector<8x32xf32>, vector<16x32xf32> -> vector<16x32xf32>
    %53 = arith.addf %34, %52 : vector<16x32xf32>
    %54 = vector.extract_strided_slice %8 {offsets = [0, 0, 16], sizes = [2, 8, 8], strides = [1, 1, 1]} : vector<2x8x32xf32> to vector<2x8x8xf32>
    %55 = vector.extract_strided_slice %10 {offsets = [0, 0, 16], sizes = [2, 8, 8], strides = [1, 1, 1]} : vector<2x8x32xf32> to vector<2x8x8xf32>
    %56 = vector.extract_strided_slice %12 {offsets = [0, 0, 16], sizes = [2, 8, 8], strides = [1, 1, 1]} : vector<2x8x32xf32> to vector<2x8x8xf32>
    %cst_22 = arith.constant dense<0.000000e+00> : vector<2x8x8xf32>
    %57 = tpu.matmul %54, %55, %cst_22 {dimension_numbers = #tpu.dot_dimension_numbers<[2], [2], [1], [1], [0, 0, 0, 1, 1, 1], [0], [0]>} : vector<2x8x8xf32>, vector<2x8x8xf32>, vector<2x8x8xf32> -> vector<2x8x8xf32>
    %58 = arith.addf %57, %13 : vector<2x8x8xf32>
    %cst_23 = arith.constant dense<0xFF800000> : vector<2x8xf32>
    %59 = vector.multi_reduction <maximumf>, %58, %cst_23 [2] : vector<2x8x8xf32> to vector<2x8xf32>
    %60 = vector.shape_cast %59 : vector<2x8xf32> to vector<2x8x1xf32>
    %61 = vector.broadcast %60 : vector<2x8x1xf32> to vector<2x8x8xf32>
    %62 = arith.subf %58, %61 : vector<2x8x8xf32>
    %63 = math.exp %62 : vector<2x8x8xf32>
    %cst_24 = arith.constant dense<0.000000e+00> : vector<2x8xf32>
    %64 = vector.multi_reduction <add>, %63, %cst_24 [2] : vector<2x8x8xf32> to vector<2x8xf32>
    %65 = vector.shape_cast %64 : vector<2x8xf32> to vector<2x8x1xf32>
    %cst_25 = arith.constant dense<0.000000e+00> : vector<2x8x8xf32>
    %66 = tpu.matmul %63, %56, %cst_25 {dimension_numbers = #tpu.dot_dimension_numbers<[2], [1], [1], [2], [0, 0, 0, 1, 1, 2], [0], [0]>} : vector<2x8x8xf32>, vector<2x8x8xf32>, vector<2x8x8xf32> -> vector<2x8x8xf32>
    %67 = vector.broadcast %65 : vector<2x8x1xf32> to vector<2x8x8xf32>
    %68 = arith.divf %66, %67 : vector<2x8x8xf32>
    %69 = vector.shape_cast %68 : vector<2x8x8xf32> to vector<16x8xf32>
    %70 = vector.extract_strided_slice %14 {offsets = [16, 0], sizes = [8, 32], strides = [1, 1]} : vector<32x32xf32> to vector<8x32xf32>
    %cst_26 = arith.constant dense<0.000000e+00> : vector<16x32xf32>
    %71 = tpu.matmul %69, %70, %cst_26 {dimension_numbers = #tpu.dot_dimension_numbers<[1], [0], [0], [1], [0, 0, 1, 1], [], []>} : vector<16x8xf32>, vector<8x32xf32>, vector<16x32xf32> -> vector<16x32xf32>
    %72 = arith.addf %53, %71 : vector<16x32xf32>
    %73 = vector.extract_strided_slice %8 {offsets = [0, 0, 24], sizes = [2, 8, 8], strides = [1, 1, 1]} : vector<2x8x32xf32> to vector<2x8x8xf32>
    %74 = vector.extract_strided_slice %10 {offsets = [0, 0, 24], sizes = [2, 8, 8], strides = [1, 1, 1]} : vector<2x8x32xf32> to vector<2x8x8xf32>
    %75 = vector.extract_strided_slice %12 {offsets = [0, 0, 24], sizes = [2, 8, 8], strides = [1, 1, 1]} : vector<2x8x32xf32> to vector<2x8x8xf32>
    %cst_27 = arith.constant dense<0.000000e+00> : vector<2x8x8xf32>
    %76 = tpu.matmul %73, %74, %cst_27 {dimension_numbers = #tpu.dot_dimension_numbers<[2], [2], [1], [1], [0, 0, 0, 1, 1, 1], [0], [0]>} : vector<2x8x8xf32>, vector<2x8x8xf32>, vector<2x8x8xf32> -> vector<2x8x8xf32>
    %77 = arith.addf %76, %13 : vector<2x8x8xf32>
    %cst_28 = arith.constant dense<0xFF800000> : vector<2x8xf32>
    %78 = vector.multi_reduction <maximumf>, %77, %cst_28 [2] : vector<2x8x8xf32> to vector<2x8xf32>
    %79 = vector.shape_cast %78 : vector<2x8xf32> to vector<2x8x1xf32>
    %80 = vector.broadcast %79 : vector<2x8x1xf32> to vector<2x8x8xf32>
    %81 = arith.subf %77, %80 : vector<2x8x8xf32>
    %82 = math.exp %81 : vector<2x8x8xf32>
    %cst_29 = arith.constant dense<0.000000e+00> : vector<2x8xf32>
    %83 = vector.multi_reduction <add>, %82, %cst_29 [2] : vector<2x8x8xf32> to vector<2x8xf32>
    %84 = vector.shape_cast %83 : vector<2x8xf32> to vector<2x8x1xf32>
    %cst_30 = arith.constant dense<0.000000e+00> : vector<2x8x8xf32>
    %85 = tpu.matmul %82, %75, %cst_30 {dimension_numbers = #tpu.dot_dimension_numbers<[2], [1], [1], [2], [0, 0, 0, 1, 1, 2], [0], [0]>} : vector<2x8x8xf32>, vector<2x8x8xf32>, vector<2x8x8xf32> -> vector<2x8x8xf32>
    %86 = vector.broadcast %84 : vector<2x8x1xf32> to vector<2x8x8xf32>
    %87 = arith.divf %85, %86 : vector<2x8x8xf32>
    %88 = vector.shape_cast %87 : vector<2x8x8xf32> to vector<16x8xf32>
    %89 = vector.extract_strided_slice %14 {offsets = [24, 0], sizes = [8, 32], strides = [1, 1]} : vector<32x32xf32> to vector<8x32xf32>
    %cst_31 = arith.constant dense<0.000000e+00> : vector<16x32xf32>
    %90 = tpu.matmul %88, %89, %cst_31 {dimension_numbers = #tpu.dot_dimension_numbers<[1], [0], [0], [1], [0, 0, 1, 1], [], []>} : vector<16x8xf32>, vector<8x32xf32>, vector<16x32xf32> -> vector<16x32xf32>
    %91 = arith.addf %72, %90 : vector<16x32xf32>
    %c0_32 = arith.constant 0 : index
    %c0_33 = arith.constant 0 : index
    %92 = vector.load %arg6[%c0_32, %c0_33] : memref<1x32xf32, #tpu.memory_space<vmem>>, vector<1x32xf32>
    %93 = vector.broadcast %92 : vector<1x32xf32> to vector<16x32xf32>
    %94 = arith.addf %91, %93 : vector<16x32xf32>
    %95 = vector.shape_cast %94 : vector<16x32xf32> to vector<2x8x32xf32>
    %c0_34 = arith.constant 0 : index
    %c0_35 = arith.constant 0 : index
    %c0_36 = arith.constant 0 : index
    %96 = vector.load %arg7[%c0_34, %c0_35, %c0_36] : memref<2x8x32xf32, #tpu.memory_space<vmem>>, vector<2x8x32xf32>
    tpu.vector_store %arg7[%c0_34, %c0_35, %c0_36], %95 {strides = array<i32>} : memref<2x8x32xf32, #tpu.memory_space<vmem>>, vector<2x8x32xf32>,
    return
  }
  func.func @transform_0(%arg0: i32) -> (i32, i32, i32) {
    %c0_i32 = arith.constant 0 : i32
    %c0_i32_0 = arith.constant 0 : i32
    %c0_i32_1 = arith.constant 0 : i32
    return %arg0, %c0_i32, %c0_i32_0 : i32, i32, i32
  }
  func.func @transform_1(%arg0: i32) -> (i32, i32, i32) {
    %c0_i32 = arith.constant 0 : i32
    %c0_i32_0 = arith.constant 0 : i32
    %c0_i32_1 = arith.constant 0 : i32
    return %arg0, %c0_i32, %c0_i32_0 : i32, i32, i32
  }
  func.func @transform_2(%arg0: i32) -> (i32, i32) {
    %c0_i32 = arith.constant 0 : i32
    %c0_i32_0 = arith.constant 0 : i32
    %c0_i32_1 = arith.constant 0 : i32
    return %c0_i32, %c0_i32_0 : i32, i32
  }
  func.func @transform_3(%arg0: i32) -> (i32, i32) {
    %c0_i32 = arith.constant 0 : i32
    %c0_i32_0 = arith.constant 0 : i32
    %c0_i32_1 = arith.constant 0 : i32
    return %c0_i32, %c0_i32_0 : i32, i32
  }
  func.func @transform_4(%arg0: i32) -> (i32, i32) {
    %c0_i32 = arith.constant 0 : i32
    %c0_i32_0 = arith.constant 0 : i32
    %c0_i32_1 = arith.constant 0 : i32
    return %c0_i32, %c0_i32_0 : i32, i32
  }
  func.func @transform_5(%arg0: i32) -> (i32, i32) {
    %c0_i32 = arith.constant 0 : i32
    %c0_i32_0 = arith.constant 0 : i32
    %c0_i32_1 = arith.constant 0 : i32
    return %c0_i32, %c0_i32_0 : i32, i32
  }
  func.func @transform_6(%arg0: i32) -> (i32, i32, i32) {
    %c0_i32 = arith.constant 0 : i32
    %c0_i32_0 = arith.constant 0 : i32
    %c0_i32_1 = arith.constant 0 : i32
    return %arg0, %c0_i32, %c0_i32_0 : i32, i32, i32
  }
}

</mosaic_0001>

<bundles_post_ra>
// kernel: tpu_custom_call.1
= control target key start
LH: loop header
LB: loop body
LE: loop exit
PB: predicated region body
PF: predicated region fallthrough
CT: control target
= control target key end

     0   :  { %s3228_s0 = inlined_call_operand.hbm [shape: f32[8,8,32], index: 0, kind: input, shape index: {}]   ;;  %s3229_s1 = inlined_call_operand.hbm [shape: f32[8,8,8], index: 1, kind: input, shape index: {}]   ;;  %s3230_s2 = inlined_call_operand.hbm [shape: f32[32,96], index: 2, kind: input, shape index: {}]   ;;  %s3231_s3 = inlined_call_operand.vmem [shape: f32[1,96], index: 3, kind: input, shape index: {}]   ;;  %s3232_s4 = inlined_call_operand.hbm [shape: f32[32,32], index: 4, kind: input, shape index: {}]   ;;  %s3233_s5 = inlined_call_operand.vmem [shape: f32[1,32], index: 5, kind: input, shape index: {}]   ;;  %s3234_s6 = inlined_call_operand.hbm [shape: f32[8,8,32], index: 6, kind: output, shape index: {}]  }
   0x1   :  { %3242 = sst [smem:[#allocation16_spill]] %s3228_s0 }
   0x2   :  { %3243 = sst [smem:[#allocation17_spill]] %s3230_s2 }
   0x3   :  { %3244 = sst [smem:[#allocation18_spill]] %s3232_s4 }
   0x4   :  { %11 = vsyncpa [#allocation3], 0 }
   0x5   :  { %13 = vsyncpa [#allocation3 + $0x1], 0 }
   0x6   :  { %14 = vsyncpa [#allocation6], 0 }
   0x7   :  { %16 = vsyncpa [#allocation6 + $0x1], 0 }
   0x8   :  { %17 = vsyncpa [#allocation9], 0 }
   0x9   :  { %18 = vsyncpa [#allocation4], 0 }
   0xa   :  { %20 = vsyncpa [#allocation4 + $0x1], 0  ;;  %s2816_s21 = smov 0   ;;  %s2818_s22 = smov 0  }
   0xb   :  { %s2820_s23 = smov 0   ;;  %s2822_s24 = smov 0  }
   0xc LB: > { %s2837_s25 = sadd.s32 4294967295, %s2757_s24   ;;  %s2230_s26 = sadd.s32 4294967294, %s2757_s24   ;;  %s2757_s24 = sphi %s2822_s24, %s3266_s24   ;;  %s2753_s23 = sphi %s2820_s23, %s3265_s23   ;;  %s2749_s22 = sphi %s2818_s22, %s3264_s22   ;;  %s2745_s21 = sphi %s2816_s21, %s3263_s21  }
   0xd   : > { %p46_p0 = scmp.ne.s32.totalorder %s2749_s22, %s2745_s21  ;;  %p3239_p1 = scmp.eq.s32.totalorder %s2837_s25, 0 }
   0xe   : > { %p180_p2 = scmp.eq.s32.totalorder %s2837_s25, 3  ;;  %p186_p3 = scmp.eq.s32.totalorder %s2230_s26, 3 }
   0xf   : > { %p2846_p4 = por %p3239_p1, %p46_p0  ;;  %p2231_p5 = scmp.ge.s32.totalorder %s2757_s24, 1 }
  0x10   : > { %p2851_p6 = por %p186_p3, %p46_p0  ;;  %p193_p7 = scmp.lt.s32.totalorder %s2757_s24, 5 }
  0x11   : > { %s3245_s27 = scalar_select %p2846_p4, 1, 0 }
  0x12   : > { %s3246_s28 = scalar_select %p2851_p6, 1, 0 }
  0x13   : > { %p2856_p8 = pnand %p2231_p5, %p193_p7  ;;  %s2759_s30 = smov [#allocation7]  }
  0x14   : > { %s205_s7 = sshll.u32 %s2759_s30, 4  ;;  %s2760_s9 = smov [#allocation8]   ;;  %s206_s7 = int_to_ptr.vmem [resolvable:$true] %s205_s7 }
  0x15   : > { %p2466_p9 = pneg %p2856_p8  ;;  %s221_s10 = sshll.u32 %s2760_s9, 4  ;;  %s222_s10 = int_to_ptr.vmem [resolvable:$true] %s221_s10 }
  0x16   : > { %s2584_s11 = scalar_lea.vmem %s206_s7, 512  ;;  %p2592_p3 = scmp.lt.s32.totalorder %s206_s7, %s206_s7 }
  0x17   : > { %p2864_p10 = pnand %p2466_p9, %p3239_p1  ;;  %p2585_p12 = scmp.ne.s32.totalorder %s206_s7, %s2584_s11 }
  0x18   : > { %p2593_p5 = scmp.lt.s32.totalorder %s2584_s11, %s2584_s11 }
  0x19   : > { %p2575_p11 = pneg %p2864_p10 }
  0x1a   : > { %p2594_p7 = por %p2593_p5, %p2592_p3 }
  0x1b   : > { %p2587_p13 = pnand %p2585_p12, %p2575_p11 }
  0x1d   : > { %p2588_p0 = pneg %p2587_p13 }
  0x1f   : > { %p2595_p9 = pnand %p2594_p7, %p2588_p0 }
  0x21   : > { %2598 = shalt.err (!%p2595_p9)
}
  0x22   : > { %s3235_s12 = smov 128   ;;  %s3237_s13 = smov 8  }
  0x23   : > { %s3249_s2 = sld [smem:[#allocation17_spill]]  ;;  %s2610_s16 = scalar_lea.vmem %s222_s10, 512 }
  0x24   : > { %p2611_p12 = scmp.ne.s32.totalorder %s222_s10, %s2610_s16  ;;  %p2618_p0 = scmp.lt.s32.totalorder %s222_s10, %s222_s10 }
  0x25   : > { %p2619_p5 = scmp.lt.s32.totalorder %s2610_s16, %s2610_s16 }
  0x26   : > { %p2613_p13 = pnand %p2611_p12, %p2575_p11 }
  0x27   : > { %p2620_p7 = por %p2619_p5, %p2618_p0 }
  0x28   : > { %p2614_p3 = pneg %p2613_p13 }
  0x29   : > { %2469 = dma.hbm_to_vmem [thread:$0]  (!%p2864_p10), %s3249_s2, 512, %s206_s7, [#allocation6], %s3235_s12, %s3235_s12, %s3237_s13  }
  0x2a   : > { %p2621_p9 = pnand %p2620_p7, %p2614_p3 }
  0x2c   : > { %2624 = shalt.err (!%p2621_p9)
}
  0x2d   : > { %s3250_s4 = sld [smem:[#allocation18_spill]]  ;;  %s2893_s19 = sadd.s32 1, %s2757_s24  }
  0x2e   : > { %s33_s20 = sadd.s32 1, %s2753_s23  ;;  %s30_s26 = ssub.s32 %s2757_s24, %s2893_s19 }
  0x2f   : > { %p40_p11 = scmp.ne.s32.totalorder %s2753_s23, %s2749_s22  ;;  %p31_p12 = scmp.eq.s32.totalorder %s30_s26, 0 }
  0x30   : > { %p41_p13 = scmp.eq.s32.totalorder %s2757_s24, 0  ;;  %p2486_p0 = scmp.lt.s32.totalorder %s2757_s24, 4 }
  0x31   : > { %p2903_p3 = por %p180_p2, %p40_p11  ;;  %s238_s8 = sand.u32 1, %s2753_s23  }
  0x32   : > { %s2909_s7 = scalar_select %p31_p12, %s2753_s23, %s33_s20  }
  0x33   : > { %2472 = dma.hbm_to_vmem [thread:$0]  (!%p2864_p10), %s3250_s4, 512, %s222_s10, [#allocation9], %s3235_s12, %s3235_s12, %s3237_s13  }
  0x34   : > { %s3251_s30 = scalar_select %p2903_p3, 1, 0 }
  0x35   : > { %p42_p5 = por %p41_p13, %p40_p11  ;;  %s2235_s9 = sshll.u32 %s238_s8, 4 }
  0x36   : > { %s2288_s10 = sshll.u32 %s2757_s24, 8  ;;  %s3252_s0 = sld [smem:[#allocation16_spill]] }
  0x37   : > { %s242_s16 = scalar_lea.vmem [#allocation2], %s2235_s9  ;;  %p2920_p2 = pnand %p2486_p0, %p42_p5 }
  0x38   : > { %s249_s17 = sshll.u32 %s242_s16, 4  ;;  %s2927_s12 = scalar_lea.hbm %s3229_s1, %s2288_s10  ;;  %s2918_s17 = int_to_ptr.vmem [resolvable:$true] %s249_s17 }
  0x39   : > { %s263_s11 = scalar_lea.vmem [#allocation5], %s2235_s9  ;;  %s2931_s13 = scalar_lea.sflag [#allocation3], %s238_s8 }
  0x3a   : > { %s2929_s14 = sshll.u32 %s263_s11, 4  ;;  %p2627_p7 = pneg %p2920_p2  ;;  %s2962_s14 = int_to_ptr.vmem [resolvable:$true] %s2929_s14 }
  0x3c   : > { %s2916_s15 = scalar_lea.hbm %s3252_s0, %s2288_s10  ;;  %s2630_s20 = scalar_lea.hbm %s3252_s0, 1024 }
  0x3d   : > { %s2625_s2 = scalar_lea.hbm %s2916_s15, 256  ;;  %p2631_p12 = scmp.lt.s32.totalorder %s2916_s15, %s3252_s0 }
  0x3e   : > { %p2626_p10 = scmp.ne.s32.totalorder %s2916_s15, %s2625_s2  ;;  %p2632_p13 = scmp.lt.s32.totalorder %s2630_s20, %s2625_s2 }
  0x40   : > { %p2628_p9 = pnand %p2627_p7, %p2626_p10  ;;  %p2633_p0 = por %p2632_p13, %p2631_p12 }
  0x42   : > { %p2629_p11 = pneg %p2628_p9 }
  0x44   : > { %p2634_p5 = pnand %p2633_p0, %p2629_p11 }
  0x46   : > { %2637 = shalt.err (!%p2634_p5)
}
  0x47   : > { %s2638_s8 = scalar_lea.vmem %s2918_s17, 256  ;;  %s2763_s4 = smov [#allocation2]  }
  0x48   : > { %p2639_p1 = scmp.ne.s32.totalorder %s2918_s17, %s2638_s8  ;;  %s2643_s9 = sshll.u32 %s2763_s4, 4  ;;  %s2644_s9 = int_to_ptr.vmem [resolvable:$false] %s2643_s9 }
  0x49   : > { %s2645_s11 = scalar_lea.vmem %s2644_s9, 512  ;;  %p2646_p6 = scmp.lt.s32.totalorder %s2918_s17, %s2644_s9 }
  0x4a   : > { %p2641_p10 = pnand %p2639_p1, %p2627_p7  ;;  %p2647_p3 = scmp.lt.s32.totalorder %s2645_s11, %s2638_s8 }
  0x4c   : > { %p2642_p9 = pneg %p2641_p10  ;;  %p2648_p4 = por %p2647_p3, %p2646_p6 }
  0x4e   : > { %p2649_p12 = pnand %p2648_p4, %p2642_p9 }
  0x50   : > { %2652 = shalt.err (!%p2649_p12)
}
  0x51   : > { %s3254_s2 = smov 8   ;;  %s3255_s16 = smov 128  }
  0x52   : > { %2476 = dma.hbm_to_vmem [thread:$0]  (!%p2920_p2), %s2916_s15, 256, %s2918_s17, %s2931_s13, %s3255_s16, %s3255_s16, %s3254_s2  }
  0x53   : > { %s259_s20 = sand.u32 1, %s2757_s24   ;;  %s2653_s10 = scalar_lea.hbm %s2927_s12, 256 }
  0x54   : > { %s260_s26 = scalar_lea.sflag [#allocation6], %s259_s20  ;;  %p2654_p1 = scmp.ne.s32.totalorder %s2927_s12, %s2653_s10 }
  0x55   : > { %s2658_s9 = scalar_lea.hbm %s3229_s1, 1024  ;;  %p2659_p3 = scmp.lt.s32.totalorder %s2927_s12, %s3229_s1 }
  0x56   : > { %p2656_p4 = pnand %p2654_p1, %p2627_p7  ;;  %p2660_p11 = scmp.lt.s32.totalorder %s2658_s9, %s2653_s10 }
  0x58   : > { %p2657_p6 = pneg %p2656_p4  ;;  %p2661_p13 = por %p2660_p11, %p2659_p3 }
  0x5a   : > { %p2662_p0 = pnand %p2661_p13, %p2657_p6 }
  0x5c   : > { %2665 = shalt.err (!%p2662_p0)
}
  0x5d   : > { %s2666_s13 = scalar_lea.vmem %s2962_s14, 256  ;;  %s2764_s15 = smov [#allocation5]  }
  0x5e   : > { %p2667_p5 = scmp.ne.s32.totalorder %s2962_s14, %s2666_s13  ;;  %s2671_s17 = sshll.u32 %s2764_s15, 4  ;;  %s2672_s17 = int_to_ptr.vmem [resolvable:$false] %s2671_s17 }
  0x5f   : > { %s2673_s20 = scalar_lea.vmem %s2672_s17, 512  ;;  %p2674_p12 = scmp.lt.s32.totalorder %s2962_s14, %s2672_s17 }
  0x60   : > { %p2669_p10 = pnand %p2667_p5, %p2627_p7  ;;  %p2675_p1 = scmp.lt.s32.totalorder %s2673_s20, %s2666_s13 }
  0x62   : > { %p2670_p9 = pneg %p2669_p10  ;;  %p2676_p4 = por %p2675_p1, %p2674_p12 }
  0x64   : > { %p2677_p3 = pnand %p2676_p4, %p2670_p9 }
  0x66   : > { %2680 = shalt.err (!%p2677_p3)
}
  0x67   : > { %2479 = dma.hbm_to_vmem [thread:$0]  (!%p2920_p2), %s2927_s12, 256, %s2962_s14, %s260_s26, %s3255_s16, %s3255_s16, %s3254_s2  }
  0x68   : > { %282 = sbr.rel (%p2856_p8) target bundleno = 2667 (0xa6b), region = 44  ;;  %s2993_s0 = sand.u32 (!%p2856_p8), 1, %s2749_s22  }
  0x69   : > { %s2996_s10 = sshll.u32 (!%p2856_p8), %s2993_s0, 4  ;;  %s285_s8 = scalar_lea.sflag (!%p2856_p8), [#allocation3], %s2993_s0 }
  0x6a   : > { %s288_s18 = scalar_lea.vmem (!%p2856_p8), [#allocation2], %s2996_s10  ;;  %p3256_p7 = scmp.ne.s32.totalorder (!%p2856_p8), %s3245_s27, 0 }
  0x6d   : > { %2724 = dma.done.wait (%p3256_p7), %s285_s8, 256  }
  0x6e   : > { %2726 = vsyncadd (%p3256_p7), %s285_s8, 4294967040  ;;  %s293_s29 = sand.u32 1, %s2837_s25   ;;  %s297_s14 = scalar_lea.vmem [#allocation5], %s2996_s10 }
  0x6f   : > { %s294_s12 = scalar_lea.sflag [#allocation6], %s293_s29 }
  0x70   : > { %2728 = dma.done.wait (%p3256_p7), %s294_s12, 256  }
  0x71   : > { %2730 = vsyncadd (%p3256_p7), %s294_s12, 4294967040  ;;  %p3257_p8 = scmp.eq.s32.totalorder %s2837_s25, 0 }
  0x73   : > { %2732 = dma.done.wait (%p3257_p8), [#allocation6], 512   ;;  %p3258_p2 = pmov %p3257_p8 }
  0x75   : > { %2734 = vsyncadd (%p3258_p2), [#allocation6], 4294966784  ;;  %p3259_p6 = pmov %p3258_p2 }
  0x76   : > { %p3260_p11 = pmov %p3258_p2 }
  0x77   : > { %2736 = dma.done.wait (%p3259_p6), [#allocation9], 512  }
  0x78   : > { %2738 = vsyncadd (%p3260_p11), [#allocation9], 4294966784  ;;  %vm355_vm0 = vcmask 261120   ;;  %v347_v0 = vld [vmem:[#allocation7 + $0x18] sm:$0xff]  ;;  %v346_v1 = vld [vmem:[#allocation7 + $0x10] sm:$0xff]  ;;  %v2765_v6 = vmov 0.0  }
  0x79   : > { %2341 = vmatprep.subr.mxu0 %v347_v0  ;;  %v342_v2 = vld [vmem:[%s288_s18] sm:$0xff]  ;;  %v345_v3 = vld [vmem:[#allocation7 + $0x8] sm:$0xff]  ;;  %2352 = vmatprep.subr.mxu1 %v2765_v6  ;;  %vm2766_vm1 = vmmov 0   ;;  %s2767_s16 = smov 96   ;;  %s2768_s26 = smov 64   ;;  %vm446_vm2 = vcmask 64512  }
  0x7a   : > { %2342 = vmatpush3.msra.mxu0 %v347_v0  ;;  %2349 = vmatprep.mubr.msk.f32.mxu0 %vm355_vm0, %v342_v2  ;;  %v344_v4 = vld [vmem:[#allocation7] sm:$0xff]  ;;  %v343_v5 = vld [vmem:[%s288_s18 + $0x8] sm:$0xff]  ;;  %s2769_s4 = smov 88   ;;  %s2770_s9 = smov 120  }
  0x7b   : > { %2343 = vmatprep.subr.mxu0 %v346_v1  ;;  %2354 = vmatprep.mubr.msk.f32.mxu1 %vm2766_vm1, %v2765_v6  ;;  %v2247_v8 = vld [vmem:[%s3231_s3] ss:$0 sm:$0xff]  ;;  %v3061_v19 = vld [vmem:[%s297_s14 + $0x8] sm:$0xff]  ;;  %s2771_s11 = smov 56   ;;  %s2772_s13 = smov 80  }
  0x7c   : > { %2344 = vmatpush3.msra.mxu0 %v346_v1  ;;  %v3056_v15 = vld [vmem:[%s297_s14] sm:$0xff]  ;;  %s2773_s15 = smov 112   ;;  %s2774_s17 = smov 48  }
  0x7d   : > { %2345 = vmatprep.subr.mxu0 %v345_v3  ;;  %v439_v55 = vld [vmem:[#allocation8] sm:$0xff]  ;;  %s2775_s20 = smov 72   ;;  %s2776_s8 = smov 104  }
  0x7e   : > { %2346 = vmatpush3.msra.mxu0 %v345_v3  ;;  %s2777_s18 = smov 40   ;;  %s2290_s14 = sshll.u32 %s2837_s25, 8 }
  0x7f   : > { %2347 = vmatprep.subr.mxu0 %v344_v4  ;;  %s338_s27 = scalar_lea.vmem [#allocation10], %s2996_s10  ;;  %s2102_s25 = scalar_lea.sflag [#allocation4], %s2993_s0 }
  0x80   : > { %2348 = vmatpush3.msra.mxu0 %v344_v4  ;;  %s2115_s2 = sshll.u32 %s338_s27, 4  ;;  %p3261_p0 = scmp.ne.s32.totalorder %s3251_s30, 0  ;;  %s3184_s2 = int_to_ptr.vmem [resolvable:$true] %s2115_s2 }
  0x81   : > { %2350 = vmatmul.mubr.msk.f32.vlgmr.msra.gmra.mxu0 %vm355_vm0, %v343_v5  ;;  %2362 = vmatprep.subr.mxu0 %v2765_v6  ;;  %s2681_s10 = scalar_lea.vmem %s3184_s2, 256 }
  0x82   : > { %2364 = vmatprep.mubr.msk.f32.mxu0 %vm2766_vm1, %v2765_v6  ;;  %p2682_p13 = scmp.ne.s32.totalorder %s3184_s2, %s2681_s10 }
  0x84   : > { %p2683_p5 = pnand %p2682_p13, %p3261_p0 }
  0x86   : > { %p2684_p10 = pneg %p2683_p5 }
 0x141   : > { %v2351_v7 = vpop.f32.mrf.mxu0 }
 0x142   : > { %v3032_v11 = vadd.f32 %v2351_v7, %v2247_v8 }
 0x143   : > { %v428_v9 = vpop.f32.mrf.mxu0 }
 0x144   : > { %v3029_v10 = vadd.f32 %v2247_v8, %v428_v9  ;;  %v440_v8 = vld [vmem:[#allocation8 + $0x8] sm:$0xff] }
 0x146   : > { %444 = vrot.lane.b32.xlu0 %v3029_v10, %s2767_s16 }
 0x14a   : > { %522 = vrot.lane.b32.xlu0 %v3032_v11, %s2767_s16 }
 0x14e   : > { %616 = vrot.lane.b32.xlu0 %v3029_v10, %s2768_s26 }
 0x152   : > { %774 = vrot.lane.b32.xlu0 %v3029_v10, %s2769_s4 }
 0x156   : > { %852 = vrot.lane.b32.xlu0 %v3032_v11, %s2769_s4  ;;  %s3182_s4 = scalar_lea.hbm %s3234_s6, %s2290_s14 }
 0x15a   : > { %772 = vrot.lane.b32.xlu0 %v3029_v10, %s2770_s9 }
 0x15e   : > { %850 = vrot.lane.b32.xlu0 %v3032_v11, %s2770_s9  ;;  %s2778_s9 = smov [#allocation10]  }
 0x1b8   : > { %v445_v12 = vpop.permute.xlu0 %444 }
 0x1b9   : > { %2353 = vmatpush3.xpose.msk.msra.mxu1 %vm446_vm2, %v445_v12 }
 0x1ba   : > { %2357 = vmatprep.subr.mxu1 %v2765_v6 }
 0x1bc   : > { %2355 = vmatmul.mubr.msk.f32.vlgmr.msra.gmra.mxu1 %vm446_vm2, %v3029_v10  ;;  %v523_v13 = vpop.permute.xlu0 %522 }
 0x1bd   : > { %2358 = vmatpush3.xpose.msk.msra.mxu1 %vm446_vm2, %v523_v13  ;;  %2359 = vmatprep.mubr.msk.f32.mxu1 %vm2766_vm1, %v2765_v6 }
 0x1be   : > { %2367 = vmatprep.subr.mxu1 %v2765_v6 }
 0x1c0   : > { %2360 = vmatmul.mubr.msk.f32.vlgmr.msra.gmra.mxu1 %vm446_vm2, %v3032_v11  ;;  %v617_v14 = vpop.permute.xlu0 %616 }
 0x1c1   : > { %2363 = vmatpush3.msra.mxu0 %v617_v14  ;;  %2369 = vmatprep.mubr.msk.f32.mxu1 %vm2766_vm1, %v2765_v6 }
 0x1c2   : > { %2372 = vmatprep.subr.mxu0 %v2765_v6 }
 0x1c4   : > { %v775_v31 = vpop.permute.xlu0 %774 }
 0x1c8   : > { %v853_v33 = vpop.permute.xlu0 %852 }
 0x1cc   : > { %v773_v35 = vpop.permute.xlu0 %772 }
 0x1d0   : > { %v851_v37 = vpop.permute.xlu0 %850 }
 0x27c   : > { %v517_v16 = vpop.f32.mrf.mxu1 }
 0x27d   : > { %v518_v17 = vadd.f32 %v517_v16, %v3056_v15 }
 0x27e   : > { %v2356_v18 = vpop.f32.mrf.mxu1 }
 0x27f   : > { %v598_v20 = vsel %vm446_vm2, %v518_v17, -inf }
 0x280   : > { %599 = vmax.xlane.f32.xlu1 %v598_v20  ;;  %v594_v21 = vpop.f32.mrf.mxu1 }
 0x281   : > { %v595_v22 = vadd.f32 %v594_v21, %v3061_v19 }
 0x282   : > { %v2361_v23 = vpop.f32.mrf.mxu1 }
 0x283   : > { %v601_v24 = vsel %vm446_vm2, %v595_v22, -inf }
 0x284   : > { %602 = vmax.xlane.f32.xlu1 %v601_v24 }
 0x295   : > { %692 = vrot.lane.b32.xlu1 %v3032_v11, %s2768_s26 }
 0x309   : > { %v600_v25 = vpop.xlane.xlu1 %599 }
 0x30a   : > { %v604_v26 = vsub.f32 %v518_v17, %v600_v25 }
 0x30c   : > { %v606_v27 = vmul.f32 1.442695, %v604_v26 }
 0x30d   : > { %v603_v28 = vpop.xlane.xlu1 %602 }
 0x30e   : > { %2541 = vpow2.f32 %v606_v27  ;;  %v605_v29 = vsub.f32 %v595_v22, %v603_v28 }
 0x310   : > { %v608_v30 = vmul.f32 1.442695, %v605_v29 }
 0x311   : > { %v693_v32 = vpop.permute.xlu1 %692 }
 0x312   : > { %2543 = vpow2.f32 %v608_v30  ;;  %2368 = vmatpush3.msra.mxu1 %v693_v32 }
 0x313   : > { %2377 = vmatprep.subr.mxu1 %v2765_v6 }
 0x31b   : > { %v2542_v34 = vpop.eup %2541 }
 0x31c   : > { %2365 = vmatmul.mubr.msk.f32.vlgmr.msra.gmra.mxu0 %vm446_vm2, %v2542_v34  ;;  %v610_v51 = vsel %vm446_vm2, %v2542_v34, 0.0 }
 0x31d   : > { %2373 = vmatpush3.xpose.msk.msra.mxu0 %vm446_vm2, %v775_v31  ;;  %2374 = vmatprep.mubr.msk.f32.mxu0 %vm2766_vm1, %v2765_v6 }
 0x31e   : > { %2382 = vmatprep.subr.mxu0 %v2765_v6 }
 0x31f   : > { %v2544_v36 = vpop.eup %2543 }
 0x320   : > { %2370 = vmatmul.mubr.msk.f32.vlgmr.msra.gmra.mxu1 %vm446_vm2, %v2544_v36  ;;  %2375 = vmatmul.mubr.msk.f32.vlgmr.msra.gmra.mxu0 %vm446_vm2, %v773_v35  ;;  %v613_v50 = vsel %vm446_vm2, %v2544_v36, 0.0 }
 0x321   : > { %2378 = vmatpush3.xpose.msk.msra.mxu1 %vm446_vm2, %v853_v33  ;;  %2379 = vmatprep.mubr.msk.f32.mxu1 %vm2766_vm1, %v2765_v6 }
 0x322   : > { %2387 = vmatprep.subr.mxu1 %v2765_v6  ;;  %2384 = vmatprep.mubr.msk.f32.mxu0 %vm2766_vm1, %v2765_v6 }
 0x324   : > { %2380 = vmatmul.mubr.msk.f32.vlgmr.msra.gmra.mxu1 %vm446_vm2, %v851_v37 }
 0x325   : > { %2389 = vmatprep.mubr.msk.f32.mxu1 %vm2766_vm1, %v2765_v6 }
 0x3dc   : > { %v688_v38 = vpop.f32.mrf.mxu0 }
 0x3de   : > { %v2366_v39 = vpop.f32.mrf.mxu0 }
 0x3e0   : > { %v764_v40 = vpop.f32.mrf.mxu1  ;;  %v846_v41 = vpop.f32.mrf.mxu0 }
 0x3e1   : > { %v847_v42 = vadd.f32 %v846_v41, %v3056_v15 }
 0x3e2   : > { %v2371_v43 = vpop.f32.mrf.mxu1  ;;  %v2376_v44 = vpop.f32.mrf.mxu0 }
 0x3e3   : > { %v928_v45 = vsel %vm446_vm2, %v847_v42, -inf }
 0x3e4   : > { %929 = vmax.xlane.f32.xlu1 %v928_v45  ;;  %v924_v46 = vpop.f32.mrf.mxu1 }
 0x3e5   : > { %v925_v47 = vadd.f32 %v924_v46, %v3061_v19 }
 0x3e6   : > { %v2381_v48 = vpop.f32.mrf.mxu1 }
 0x3e7   : > { %v931_v49 = vsel %vm446_vm2, %v925_v47, -inf }
 0x3e8   : > { %932 = vmax.xlane.f32.xlu0 %v931_v49 }
 0x3f5   : > { %1022 = vrot.lane.b32.xlu1 %v3032_v11, %s2771_s11 }
 0x3fe   : > { %946 = vrot.lane.b32.xlu0 %v3029_v10, %s2771_s11  ;;  %s2685_s11 = sshll.u32 %s2778_s9, 4  ;;  %s2686_s11 = int_to_ptr.vmem [resolvable:$false] %s2685_s11 }
 0x3ff   : > { %p2688_p9 = scmp.lt.s32.totalorder %s3184_s2, %s2686_s11 }
 0x419   : > { %614 = vadd.xlane.f32.xlu1 %v613_v50 }
 0x41d   : > { %611 = vadd.xlane.f32.xlu0 %v610_v51 }
 0x46d   : > { %v930_v52 = vpop.xlane.xlu1 %929 }
 0x46e   : > { %v934_v53 = vsub.f32 %v847_v42, %v930_v52  ;;  %v441_v52 = vld [vmem:[#allocation8 + $0x10] sm:$0xff] }
 0x470   : > { %v936_v54 = vmul.f32 1.442695, %v934_v53 }
 0x471   : > { %v1023_v56 = vpop.permute.xlu1 %1022  ;;  %v933_v57 = vpop.xlane.xlu0 %932 }
 0x472   : > { %2545 = vpow2.f32 %v936_v54  ;;  %v935_v58 = vsub.f32 %v925_v47, %v933_v57  ;;  %2388 = vmatpush3.msra.mxu1 %v1023_v56 }
 0x473   : > { %2397 = vmatprep.subr.mxu1 %v439_v55 }
 0x474   : > { %v938_v59 = vmul.f32 1.442695, %v935_v58 }
 0x475   : > { %v947_v60 = vpop.permute.xlu0 %946 }
 0x476   : > { %2547 = vpow2.f32 %v938_v59  ;;  %2383 = vmatpush3.msra.mxu0 %v947_v60 }
 0x477   : > { %2392 = vmatprep.subr.mxu0 %v440_v8 }
 0x47f   : > { %v2546_v61 = vpop.eup %2545 }
 0x480   : > { %2385 = vmatmul.mubr.msk.f32.vlgmr.msra.gmra.mxu0 %vm446_vm2, %v2546_v61  ;;  %v940_v62 = vsel %vm446_vm2, %v2546_v61, 0.0 }
 0x481   : > { %941 = vadd.xlane.f32.xlu1 %v940_v62  ;;  %2393 = vmatpush3.msra.mxu0 %v440_v8 }
 0x482   : > { %2402 = vmatprep.subr.mxu0 %v2765_v6 }
 0x483   : > { %v2548_v63 = vpop.eup %2547 }
 0x484   : > { %2390 = vmatmul.mubr.msk.f32.vlgmr.msra.gmra.mxu1 %vm446_vm2, %v2548_v63  ;;  %v943_v0 = vsel %vm446_vm2, %v2548_v63, 0.0 }
 0x485   : > { %944 = vadd.xlane.f32.xlu0 %v943_v0  ;;  %2398 = vmatpush3.msra.mxu1 %v439_v55 }
 0x486   : > { %2407 = vmatprep.subr.mxu1 %v2765_v6 }
 0x492   : > { %1344 = vrot.lane.b32.xlu1 %v3032_v11, %s2772_s13 }
 0x496   : > { %1264 = vrot.lane.b32.xlu1 %v3029_v10, %s2773_s15 }
 0x49b   : > { %1266 = vrot.lane.b32.xlu0 %v3029_v10, %s2772_s13  ;;  %s2687_s13 = scalar_lea.vmem %s2686_s11, 512 }
 0x49c   : > { %p2689_p12 = scmp.lt.s32.totalorder %s2687_s13, %s2681_s10 }
 0x49e   : > { %p2690_p1 = por %p2689_p12, %p2688_p9 }
 0x49f   : > { %1342 = vrot.lane.b32.xlu0 %v3032_v11, %s2773_s15 }
 0x4a0   : > { %p2691_p4 = pnand %p2690_p1, %p2684_p10 }
 0x4a2   : > { %v615_v1 = vpop.xlane.xlu1 %614 }
 0x4a3   : > { %2549 = vrcp.f32 %v615_v1 }
 0x4a6   : > { %v612_v2 = vpop.xlane.xlu0 %611 }
 0x4a7   : > { %2551 = vrcp.f32 %v612_v2 }
 0x4b0   : > { %v2550_v3 = vpop.eup %2549 }
 0x4b1   : > { %v771_v7 = vmul.f32 %v2550_v3, %v764_v40 }
 0x4b4   : > { %v2552_v4 = vpop.eup %2551 }
 0x4b5   : > { %v769_v5 = vmul.f32 %v2552_v4, %v688_v38 }
 0x4b7   : > { %2399 = vmatprep.mubr.msk.f32.mxu1 %vm446_vm2, %v769_v5 }
 0x4b8   : > { %2400 = vmatmul.mubr.msk.f32.vlgmr.msra.gmra.mxu1 %vm446_vm2, %v771_v7 }
 0x4b9   : > { %2409 = vmatprep.mubr.msk.f32.mxu1 %vm2766_vm1, %v2765_v6 }
 0x50a   : > { %v942_v9 = vpop.xlane.xlu1 %941 }
 0x50b   : > { %2553 = vrcp.f32 %v942_v9 }
 0x50e   : > { %v1345_v12 = vpop.permute.xlu1 %1344  ;;  %v945_v13 = vpop.xlane.xlu0 %944 }
 0x50f   : > { %2408 = vmatpush3.xpose.msk.msra.mxu1 %vm446_vm2, %v1345_v12  ;;  %2555 = vrcp.f32 %v945_v13 }
 0x510   : > { %2417 = vmatprep.subr.mxu1 %v2765_v6 }
 0x512   : > { %v1267_v14 = vpop.permute.xlu0 %1266  ;;  %v1265_v26 = vpop.permute.xlu1 %1264 }
 0x516   : > { %v1343_v16 = vpop.permute.xlu0 %1342 }
 0x517   : > { %2410 = vmatmul.mubr.msk.f32.vlgmr.msra.gmra.mxu1 %vm446_vm2, %v1343_v16 }
 0x518   : > { %2419 = vmatprep.mubr.msk.f32.mxu1 %vm2766_vm1, %v2765_v6  ;;  %v2554_v17 = vpop.eup %2553 }
 0x51c   : > { %v2556_v22 = vpop.eup %2555 }
 0x540   : > { %v1018_v18 = vpop.f32.mrf.mxu0 }
 0x541   : > { %v1099_v20 = vmul.f32 %v2554_v17, %v1018_v18 }
 0x542   : > { %v2386_v21 = vpop.f32.mrf.mxu0 }
 0x543   : > { %2394 = vmatprep.mubr.msk.f32.mxu0 %vm446_vm2, %v1099_v20 }
 0x544   : > { %v1094_v23 = vpop.f32.mrf.mxu1 }
 0x545   : > { %v1101_v24 = vmul.f32 %v2556_v22, %v1094_v23 }
 0x546   : > { %v2391_v25 = vpop.f32.mrf.mxu1 }
 0x547   : > { %2395 = vmatmul.mubr.msk.f32.vlgmr.msra.gmra.mxu0 %vm446_vm2, %v1101_v24 }
 0x548   : > { %2403 = vmatpush3.xpose.msk.msra.mxu0 %vm446_vm2, %v1267_v14  ;;  %2404 = vmatprep.mubr.msk.f32.mxu0 %vm2766_vm1, %v2765_v6 }
 0x549   : > { %2412 = vmatprep.subr.mxu0 %v2765_v6 }
 0x54b   : > { %2405 = vmatmul.mubr.msk.f32.vlgmr.msra.gmra.mxu0 %vm446_vm2, %v1265_v26 }
 0x54c   : > { %2414 = vmatprep.mubr.msk.f32.mxu0 %vm2766_vm1, %v2765_v6 }
 0x578   : > { %v3121_v27 = vpop.f32.mrf.mxu1 }
 0x57a   : > { %v1255_v28 = vpop.f32.mrf.mxu1 }
 0x5d7   : > { %v1416_v29 = vpop.f32.mrf.mxu1 }
 0x5d8   : > { %v1417_v30 = vadd.f32 %v1416_v29, %v3061_v19 }
 0x5d9   : > { %v2411_v31 = vpop.f32.mrf.mxu1 }
 0x5da   : > { %v1423_v32 = vsel %vm446_vm2, %v1417_v30, -inf }
 0x5db   : > { %1424 = vmax.xlane.f32.xlu0 %v1423_v32 }
 0x5f1   : > { %1438 = vrot.lane.b32.xlu0 %v3029_v10, %s2774_s17 }
 0x607   : > { %v3126_v33 = vpop.f32.mrf.mxu0 }
 0x608   : > { %v1261_v8 = vadd.f32 %v3121_v27, %v3126_v33 }
 0x609   : > { %v1174_v34 = vpop.f32.mrf.mxu0 }
 0x60a   : > { %v3128_v35 = vadd.f32 %v1255_v28, %v1174_v34  ;;  %v442_v28 = vld [vmem:[#allocation8 + $0x18] sm:$0xff] }
 0x60b   : > { %v1338_v36 = vpop.f32.mrf.mxu0 }
 0x60c   : > { %v1339_v37 = vadd.f32 %v1338_v36, %v3056_v15 }
 0x60d   : > { %v2406_v38 = vpop.f32.mrf.mxu0 }
 0x60e   : > { %v1420_v39 = vsel %vm446_vm2, %v1339_v37, -inf }
 0x60f   : > { %1421 = vmax.xlane.f32.xlu1 %v1420_v39 }
 0x620   : > { %1514 = vrot.lane.b32.xlu1 %v3032_v11, %s2774_s17 }
 0x624   : > { %1757 = vrot.lane.b32.xlu1 %v3032_v11, %s2775_s20 }
 0x664   : > { %v1425_v40 = vpop.xlane.xlu0 %1424 }
 0x665   : > { %v1427_v41 = vsub.f32 %v1417_v30, %v1425_v40  ;;  %v2282_v40 = vld [vmem:[%s3233_s5] ss:$0 sm:$0xff] }
 0x667   : > { %v1430_v42 = vmul.f32 1.442695, %v1427_v41 }
 0x668   : > { %v1439_v43 = vpop.permute.xlu0 %1438 }
 0x669   : > { %2557 = vpow2.f32 %v1430_v42  ;;  %2413 = vmatpush3.msra.mxu0 %v1439_v43 }
 0x66a   : > { %2422 = vmatprep.subr.mxu0 %v441_v52 }
 0x676   : > { %v2558_v44 = vpop.eup %2557 }
 0x677   : > { %v1435_v45 = vsel %vm446_vm2, %v2558_v44, 0.0 }
 0x678   : > { %1436 = vadd.xlane.f32.xlu0 %v1435_v45 }
 0x68e   : > { %1679 = vrot.lane.b32.xlu0 %v3029_v10, %s2775_s20 }
 0x692   : > { %1755 = vrot.lane.b32.xlu0 %v3032_v11, %s2776_s8 }
 0x698   : > { %v1422_v46 = vpop.xlane.xlu1 %1421 }
 0x699   : > { %v1426_v47 = vsub.f32 %v1339_v37, %v1422_v46 }
 0x69b   : > { %v1428_v48 = vmul.f32 1.442695, %v1426_v47 }
 0x69c   : > { %v1515_v49 = vpop.permute.xlu1 %1514 }
 0x69d   : > { %2559 = vpow2.f32 %v1428_v48  ;;  %2418 = vmatpush3.msra.mxu1 %v1515_v49 }
 0x69e   : > { %2420 = vmatmul.mubr.msk.f32.vlgmr.msra.gmra.mxu1 %vm446_vm2, %v2558_v44  ;;  %2427 = vmatprep.subr.mxu1 %v2765_v6 }
 0x69f   : > { %2429 = vmatprep.mubr.msk.f32.mxu1 %vm2766_vm1, %v2765_v6 }
 0x6a0   : > { %v1758_v55 = vpop.permute.xlu1 %1757 }
 0x6aa   : > { %v2560_v50 = vpop.eup %2559 }
 0x6ab   : > { %2415 = vmatmul.mubr.msk.f32.vlgmr.msra.gmra.mxu0 %vm446_vm2, %v2560_v50  ;;  %v1432_v51 = vsel %vm446_vm2, %v2560_v50, 0.0 }
 0x6ac   : > { %1433 = vadd.xlane.f32.xlu1 %v1432_v51  ;;  %2423 = vmatpush3.msra.mxu0 %v441_v52 }
 0x6ad   : > { %2432 = vmatprep.subr.mxu0 %v2765_v6 }
 0x6bd   : > { %1677 = vrot.lane.b32.xlu1 %v3029_v10, %s2776_s8 }
 0x701   : > { %v1437_v53 = vpop.xlane.xlu0 %1436 }
 0x705   : > { %v1680_v54 = vpop.permute.xlu0 %1679 }
 0x706   : > { %2428 = vmatpush3.xpose.msk.msra.mxu1 %vm446_vm2, %v1680_v54 }
 0x707   : > { %2437 = vmatprep.subr.mxu1 %v2765_v6 }
 0x709   : > { %v1756_v2 = vpop.permute.xlu0 %1755 }
 0x735   : > { %v1434_v56 = vpop.xlane.xlu1 %1433 }
 0x736   : > { %2561 = vrcp.f32 %v1434_v56 }
 0x737   : > { %2563 = vrcp.f32 %v1437_v53 }
 0x739   : > { %v1678_v57 = vpop.permute.xlu1 %1677 }
 0x73a   : > { %2430 = vmatmul.mubr.msk.f32.vlgmr.msra.gmra.mxu1 %vm446_vm2, %v1678_v57 }
 0x73b   : > { %2439 = vmatprep.mubr.msk.f32.mxu1 %vm2766_vm1, %v2765_v6 }
 0x743   : > { %v2562_v60 = vpop.eup %2561 }
 0x744   : > { %v2564_v62 = vpop.eup %2563 }
 0x75e   : > { %v1586_v58 = vpop.f32.mrf.mxu1 }
 0x75f   : > { %v1593_v0 = vmul.f32 %v2564_v62, %v1586_v58 }
 0x760   : > { %v2421_v59 = vpop.f32.mrf.mxu1 }
 0x76b   : > { %v1510_v61 = vpop.f32.mrf.mxu0 }
 0x76c   : > { %v1591_v63 = vmul.f32 %v2562_v60, %v1510_v61 }
 0x76d   : > { %v2416_v1 = vpop.f32.mrf.mxu0 }
 0x76e   : > { %2424 = vmatprep.mubr.msk.f32.mxu0 %vm446_vm2, %v1591_v63 }
 0x76f   : > { %2425 = vmatmul.mubr.msk.f32.vlgmr.msra.gmra.mxu0 %vm446_vm2, %v1593_v0 }
 0x770   : > { %2433 = vmatpush3.xpose.msk.msra.mxu0 %vm446_vm2, %v1758_v55  ;;  %2434 = vmatprep.mubr.msk.f32.mxu0 %vm2766_vm1, %v2765_v6 }
 0x771   : > { %2442 = vmatprep.subr.mxu0 %v2765_v6 }
 0x773   : > { %2435 = vmatmul.mubr.msk.f32.vlgmr.msra.gmra.mxu0 %vm446_vm2, %v1756_v2 }
 0x774   : > { %2444 = vmatprep.mubr.msk.f32.mxu0 %vm2766_vm1, %v2765_v6 }
 0x7fa   : > { %v1751_v3 = vpop.f32.mrf.mxu1 }
 0x7fb   : > { %v1752_v4 = vadd.f32 %v1751_v3, %v3056_v15 }
 0x7fc   : > { %v2431_v5 = vpop.f32.mrf.mxu1 }
 0x7fd   : > { %v1833_v7 = vsel %vm446_vm2, %v1752_v4, -inf }
 0x7fe   : > { %1834 = vmax.xlane.f32.xlu1 %v1833_v7 }
 0x80f   : > { %1927 = vrot.lane.b32.xlu1 %v3032_v11, %s2777_s18 }
 0x82f   : > { %v2426_v9 = vpop.f32.mrf.mxu0 }
 0x830   : > { %v1676_v12 = vadd.f32 %v2426_v9, %v1261_v8 }
 0x831   : > { %v1666_v13 = vpop.f32.mrf.mxu0 }
 0x832   : > { %v1675_v14 = vadd.f32 %v1666_v13, %v3128_v35 }
 0x833   : > { %v1829_v16 = vpop.f32.mrf.mxu0 }
 0x834   : > { %v1830_v6 = vadd.f32 %v1829_v16, %v3061_v19 }
 0x835   : > { %v2436_v17 = vpop.f32.mrf.mxu0 }
 0x836   : > { %v1836_v15 = vsel %vm446_vm2, %v1830_v6, -inf }
 0x837   : > { %1837 = vmax.xlane.f32.xlu0 %v1836_v15 }
 0x84d   : > { %1851 = vrot.lane.b32.xlu0 %v3029_v10, %s2777_s18 }
 0x887   : > { %v1835_v18 = vpop.xlane.xlu1 %1834 }
 0x888   : > { %v1839_v20 = vsub.f32 %v1752_v4, %v1835_v18 }
 0x88a   : > { %v1841_v11 = vmul.f32 1.442695, %v1839_v20 }
 0x88b   : > { %v1928_v21 = vpop.permute.xlu1 %1927 }
 0x88c   : > { %2565 = vpow2.f32 %v1841_v11  ;;  %2443 = vmatpush3.msra.mxu0 %v1928_v21 }
 0x899   : > { %v2566_v22 = vpop.eup %2565 }
 0x89a   : > { %v1845_v23 = vsel %vm446_vm2, %v2566_v22, 0.0 }
 0x89b   : > { %1846 = vadd.xlane.f32.xlu1 %v1845_v23 }
 0x8c0   : > { %v1838_v24 = vpop.xlane.xlu0 %1837 }
 0x8c1   : > { %v1840_v25 = vsub.f32 %v1830_v6, %v1838_v24 }
 0x8c3   : > { %v1843_v26 = vmul.f32 1.442695, %v1840_v25 }
 0x8c4   : > { %v1852_v19 = vpop.permute.xlu0 %1851 }
 0x8c5   : > { %2567 = vpow2.f32 %v1843_v26  ;;  %2438 = vmatpush3.msra.mxu1 %v1852_v19 }
 0x8c6   : > { %2440 = vmatmul.mubr.msk.f32.vlgmr.msra.gmra.mxu1 %vm446_vm2, %v2566_v22  ;;  %2447 = vmatprep.subr.mxu1 %v442_v28 }
 0x8c7   : > { %2448 = vmatpush3.msra.mxu1 %v442_v28 }
 0x8d2   : > { %v2568_v27 = vpop.eup %2567 }
 0x8d3   : > { %2445 = vmatmul.mubr.msk.f32.vlgmr.msra.gmra.mxu0 %vm446_vm2, %v2568_v27  ;;  %v1848_v10 = vsel %vm446_vm2, %v2568_v27, 0.0 }
 0x8d4   : > { %1849 = vadd.xlane.f32.xlu0 %v1848_v10 }
 0x924   : > { %v1847_v29 = vpop.xlane.xlu1 %1846 }
 0x925   : > { %2569 = vrcp.f32 %v1847_v29 }
 0x932   : > { %v2570_v31 = vpop.eup %2569 }
 0x95d   : > { %v1850_v30 = vpop.xlane.xlu0 %1849 }
 0x95e   : > { %2571 = vrcp.f32 %v1850_v30 }
 0x96b   : > { %v2572_v35 = vpop.eup %2571 }
 0x986   : > { %v1923_v32 = vpop.f32.mrf.mxu1 }
 0x987   : > { %v2004_v33 = vmul.f32 %v2570_v31, %v1923_v32 }
 0x988   : > { %v2441_v34 = vpop.f32.mrf.mxu1 }
 0x989   : > { %2449 = vmatprep.mubr.msk.f32.mxu1 %vm446_vm2, %v2004_v33 }
 0x993   : > { %v1999_v36 = vpop.f32.mrf.mxu0 }
 0x994   : > { %v2006_v37 = vmul.f32 %v2572_v35, %v1999_v36 }
 0x995   : > { %v2446_v38 = vpop.f32.mrf.mxu0 }
 0x996   : > { %2450 = vmatmul.mubr.msk.f32.vlgmr.msra.gmra.mxu1 %vm446_vm2, %v2006_v37 }
 0xa56   : > { %v2451_v39 = vpop.f32.mrf.mxu1 }
 0xa57   : > { %v2089_v41 = vadd.f32 %v2451_v39, %v1676_v12 }
 0xa58   : > { %v2079_v42 = vpop.f32.mrf.mxu1 }
 0xa59   : > { %v2098_v43 = vadd.f32 %v2282_v40, %v2089_v41  ;;  %v2088_v44 = vadd.f32 %v2079_v42, %v1675_v14 }
 0xa5b   : > { %2100 = vst.msk [vmem:[%s338_s27 + $0x8] sm:$0xff] %vm355_vm0, %v2098_v43  ;;  %v2097_v45 = vadd.f32 %v2282_v40, %v2088_v44 }
 0xa5d   : > { %2099 = vst.msk [vmem:[%s338_s27] sm:$0xff] %vm355_vm0, %v2097_v45 }
 0xa5e   : > { %2694 = shalt.err (!%p2691_p4)
}
 0xa5f   : > { %s2695_s15 = scalar_lea.hbm %s3182_s4, 256  ;;  %s2699_s8 = scalar_lea.hbm %s3234_s6, 1024 }
 0xa60   : > { %p2696_p3 = scmp.ne.s32.totalorder %s3182_s4, %s2695_s15  ;;  %p2700_p2 = scmp.lt.s32.totalorder %s3182_s4, %s3234_s6 }
 0xa61   : > { %p2701_p6 = scmp.lt.s32.totalorder %s2699_s8, %s2695_s15 }
 0xa62   : > { %p2697_p7 = pnand %p2696_p3, %p3261_p0 }
 0xa63   : > { %p2702_p11 = por %p2701_p6, %p2700_p2 }
 0xa64   : > { %p2698_p8 = pneg %p2697_p7 }
 0xa66   : > { %p2703_p13 = pnand %p2702_p11, %p2698_p8 }
 0xa68   : > { %2706 = shalt.err (!%p2703_p13)
}
 0xa69   : > { %s2779_s12 = smov 128   ;;  %s2780_s14 = smov 8  }
 0xa6a   : > { %2464 = dma.vmem_to_hbm [thread:$0]  (%p3261_p0), %s3184_s2, 256, %s3182_s4, %s2102_s25, %s2779_s12, %s2779_s12, %s2780_s14  }
 0xa6b PF: > { %p2489_p5 = scmp.ge.s32.totalorder %s2757_s24, 2  ;;  %s2130_s27 = sand.u32 1, %s2745_s21  }
 0xa6c   : > { %p3262_p10 = scmp.ne.s32.totalorder %s3246_s28, 0  ;;  %s2131_s16 = scalar_lea.sflag [#allocation4], %s2130_s27 }
 0xa6e   : > { %p2481_p9 = pnand %p2489_p5, %p3262_p10 }
 0xa70   : > { %p2482_p12 = pneg %p2481_p9 }
 0xa72   : > { %2740 = dma.done.wait (%p2482_p12), %s2131_s16, 256  }
 0xa73   : > { %2742 = vsyncadd (%p2482_p12), %s2131_s16, 4294967040  ;;  %p23_p1 = scmp.ge.s32.totalorder %s2893_s19, 6   ;;  %s3263_s21 = smov %s2749_s22 }
 0xa74   : > { %s3264_s22 = smov %s2753_s23  ;;  %s3265_s23 = smov %s2909_s7 }
 0xa75   : > { %s3266_s24 = smov %s2893_s19  ;;  %25 = sbr.rel (!%p23_p1) target bundleno = 12 (0xc), region = 110 }
 0xa7a   :  { %2136 = vsyncpa [#allocation3], 1 }
 0xa7b   :  { %2138 = vsyncpa [#allocation3 + $0x1], 1 }
 0xa7c   :  { %2139 = vsyncpa [#allocation6], 1 }
 0xa7d   :  { %2141 = vsyncpa [#allocation6 + $0x1], 1 }
 0xa7e   :  { %2142 = vsyncpa [#allocation9], 1 }
 0xa7f   :  { %2143 = vsyncpa [#allocation4], 1 }
 0xa80   :  { %2145 = vsyncpa [#allocation4 + $0x1], 1 }

</bundles_post_ra>
